<compile_context>
chip_gen: v6e
topology: v6e:2x2x1
jax: 0.10.0
libtpu: 0.0.40
codegen_flags: <defaults>
</compile_context>

<pallas_src>
import functools

import jax
import jax.numpy as jnp
from jax import lax
from jax.experimental import pallas as pl
from jax.experimental.pallas import tpu as pltpu

EPS = 1e-6  # matches partial(nn.BatchNorm2d, eps=1e-06) in the module spec


# ----------------------------- VMEM budgeting --------------------------------

def _vmem_budget_bytes():
    """~3/4 of physical VMEM per generation (96 MiB on v5e/v6e, 48 MiB on v7x);
    falls back to the everywhere-safe 48 MiB if the query is unavailable."""
    cap = None
    try:
        cap = getattr(pltpu.get_tpu_info(), "vmem_capacity_bytes", None)
    except Exception:
        cap = None
    if not cap:
        cap = 64 * 1024 * 1024
    return min(int(cap) * 3 // 4, 100 * 1024 * 1024)


def _padded_bytes(rows, cols, itemsize):
    """Bytes of a (rows, cols) array in VMEM, rounded to the (8,128)-word tiling."""
    sub = max(32 // itemsize, 1)          # f32 -> 8 sublanes, bf16 -> 16
    return pl.cdiv(rows, sub) * sub * pl.cdiv(cols, 128) * 128 * itemsize


def _step_vmem_bytes(n_img, *, cin, med, cout, hw, isz, emit_x2, res_conv):
    pb = _padded_bytes
    act = 2 * n_img * (pb(cin, hw, isz) + pb(cout, hw, isz))   # x, out (dbl-buf)
    if emit_x2:
        act += 2 * n_img * pb(med, hw, isz)
    weights = 2 * (pb(med, cin, isz) + pb(med, 9 * med, isz) + pb(cout, med, isz))
    if res_conv:
        weights += 2 * pb(cout, cin, isz)
    biases = 2 * 2 * (pb(med, 1, 4) + pb(cout, 1, 4))
    col = pb(9 * med, hw, isz)                                  # im2col scratch
    live = 2 * pb(med, hw, 4) + 2 * pb(cout, hw, 4) + 2 * pb(med, hw, isz)
    margin = 2 * 1024 * 1024                                    # spill headroom
    return act + weights + biases + col + live + margin


def _pick_images_per_step(n_images, step_bytes, budget):
    """Largest divisor of n_images that fits the VMEM budget while keeping >= 2
    grid steps (v7x 2-TC sharding / pipeline overlap)."""
    assert step_bytes(1) <= budget, (
        f"ConvBlock step (~{step_bytes(1) / 2**20:.1f} MiB) exceeds the "
        f"{budget / 2**20:.0f} MiB VMEM budget; H-tiling with halo needed (TODO)")
    best = 1
    for b in range(2, n_images + 1):
        if n_images % b:
            continue
        if n_images // b < 2:
            break
        if step_bytes(b) > budget // 2:
            break
        best = b
    return best


# ----------------------------- the fused kernel -------------------------------

def _conv_block_kernel(*refs, H, W, n_img, res_conv, emit_x2):
    """Fused ConvBlock forward for n_img images, channels-on-sublanes /
    flattened-HW-on-lanes (native NCHW) layout.

    refs = [x, w1, b1, w2, b2, w3, b3, (wr, br)] + [out, (x2)] + [col scratch]
      x   : (n_img, cin, hw)        compute dtype
      w1  : (med, cin)   b1: (med, 1)  f32        (bn1 folded)
      w2  : (med, 9*med) b2: (med, 1)  f32        (bn2 folded, tap-major cols)
      w3  : (cout, med)  b3: (cout, 1) f32        (bn3 folded)
      wr  : (cout, cin)  br: (cout, 1) f32        (residual conv + bn folded)
      out : (n_img, cout, hw)       x2: (n_img, med, hw)
      col : (9*med, hw) VMEM scratch (im2col matrix, fully overwritten)
    """
    x_ref, w1_ref, b1_ref, w2_ref, b2_ref, w3_ref, b3_ref = refs[:7]
    n_in = 7
    wr_ref = br_ref = None
    if res_conv:
        wr_ref, br_ref = refs[7:9]
        n_in = 9
    out_ref = refs[n_in]
    x2_ref = refs[n_in + 1] if emit_x2 else None
    col_ref = refs[-1]

    med = w1_ref.shape[0]
    hw = H * W
    cdt = x_ref.dtype

    w1 = w1_ref[...]
    b1 = b1_ref[...]
    w2 = w2_ref[...]
    b2 = b2_ref[...]
    w3 = w3_ref[...]
    b3 = b3_ref[...]
    if res_conv:
        wr = wr_ref[...]
        br = br_ref[...]

    # Lane index (= h*W + w) -> edge masks for the 3x3 taps.  The shifts are
    # XLU lane rolls; only the image borders need VPU masking.
    lane = lax.broadcasted_iota(jnp.int32, (med, hw), 1)
    if (W & (W - 1)) == 0:
        ww = jnp.bitwise_and(lane, W - 1)
    else:
        ww = lane % W  # TODO(synk): non-power-of-two W relies on vector remainder

    for b in range(n_img):                       # static unroll over images
        xT = x_ref[b]                            # (cin, hw)

        # conv1 (1x1) + bn1 (folded) + ReLU, f32 accumulation on the MXU.
        x1 = jnp.dot(w1, xT, preferred_element_type=jnp.float32)
        x1 = jnp.maximum(x1 + b1, 0.0).astype(cdt)            # (med, hw)

        # conv2 (3x3, pad=1): build the im2col matrix (9*med, hw) in VMEM via
        # lane rolls + edge masks, then ONE K=9*med MXU matmul.
        k = 0
        for dh in (-1, 0, 1):
            for dw in (-1, 0, 1):
                shift = dh * W + dw
                if shift == 0:
                    t = x1
                else:
                    t = pltpu.roll(x1, (-shift) % hw, axis=1)
                    conds = []
                    if dh == -1:
                        conds.append(lane >= W)
                    elif dh == 1:
                        conds.append(lane < (H - 1) * W)
                    if dw == -1:
                        conds.append(ww >= 1)
                    elif dw == 1:
                        conds.append(ww <= W - 2)
                    valid = conds[0]
                    for c in conds[1:]:
                        valid = jnp.logical_and(valid, c)
                    t = jnp.where(valid, t, jnp.zeros_like(t))
                col_ref[k * med:(k + 1) * med, :] = t
                k += 1

        x2 = jnp.dot(w2, col_ref[...], preferred_element_type=jnp.float32)
        x2 = jnp.maximum(x2 + b2, 0.0)                          # (med, hw) f32
        x2c = x2.astype(cdt)
        if emit_x2:
            x2_ref[b] = x2c

        # conv3 (1x1) + bn3 + residual (identity or fused projection) + ReLU.
        y = jnp.dot(w3, x2c, preferred_element_type=jnp.float32) + b3
        if res_conv:
            y = y + jnp.dot(wr, xT, preferred_element_type=jnp.float32) + br
        else:
            y = y + xT.astype(jnp.float32)
        out_ref[b] = jnp.maximum(y, 0.0).astype(out_ref.dtype)


# ----------------------------- params & BN folding ----------------------------

def _fold_bn(w_out_rows, gamma, beta, mean, var):
    """Fold inference BN into a weight whose FIRST dim is the output channel."""
    s = gamma / jnp.sqrt(var + EPS)
    return w_out_rows * s[:, None], (beta - mean * s)[:, None]   # bias (O,1) f32


def init_params(key, inplanes, outplanes, res_conv):
    med = outplanes // 4  # expansion = 4
    ks = jax.random.split(key, 8)

    def conv_w(k, shape):  # PyTorch OIHW convention
        return 0.2 * jax.random.normal(k, shape, jnp.float32)

    def bn_p(k, c):
        k1, k2, k3, k4 = jax.random.split(k, 4)
        gamma = 1.0 + 0.1 * jax.random.normal(k1, (c,), jnp.float32)
        beta = 0.1 * jax.random.normal(k2, (c,), jnp.float32)
        mean = 0.1 * jax.random.normal(k3, (c,), jnp.float32)
        var = 0.5 + jnp.abs(jax.random.normal(k4, (c,), jnp.float32))
        return (gamma, beta, mean, var)

    p = {
        "conv1_w": conv_w(ks[0], (med, inplanes, 1, 1)),
        "bn1": bn_p(ks[1], med),
        "conv2_w": conv_w(ks[2], (med, med, 3, 3)),
        "bn2": bn_p(ks[3], med),
        "conv3_w": conv_w(ks[4], (outplanes, med, 1, 1)),
        "bn3": bn_p(ks[5], outplanes),
    }
    if res_conv:
        p["convr_w"] = conv_w(ks[6], (outplanes, inplanes, 1, 1))
        p["bnr"] = bn_p(ks[7], outplanes)
    return p


# ----------------------------- forward ---------------------------------------

def conv_block_forward_pallas(x_nchw, p, *, res_conv=False, return_x_2=True,
                              compute_dtype=jnp.bfloat16):
    """ConvBlock.forward on an NCHW tensor (x_t=None, stride=1, groups=1)."""
    N, cin, H, W = x_nchw.shape
    med = p["conv1_w"].shape[0]
    cout = p["conv3_w"].shape[0]
    hw = H * W

    # Fold BN running stats into the conv weights host-side.
    w1f, b1 = _fold_bn(p["conv1_w"][:, :, 0, 0], *p["bn1"])            # (med, cin)
    w2_flat = jnp.transpose(p["conv2_w"], (0, 2, 3, 1)).reshape(med, 9 * med)
    w2f, b2 = _fold_bn(w2_flat, *p["bn2"])                             # (med, 9*med)
    w3f, b3 = _fold_bn(p["conv3_w"][:, :, 0, 0], *p["bn3"])            # (cout, med)

    cdt = compute_dtype
    isz = jnp.dtype(cdt).itemsize
    x_rows = x_nchw.reshape(N, cin, hw).astype(cdt)        # free NCHW reshape

    args = [x_rows, w1f.astype(cdt), b1, w2f.astype(cdt), b2, w3f.astype(cdt), b3]
    in_specs = [
        None,  # x spec filled in once n_img is chosen
        pl.BlockSpec((med, cin), lambda i: (0, 0)),
        pl.BlockSpec((med, 1), lambda i: (0, 0)),
        pl.BlockSpec((med, 9 * med), lambda i: (0, 0)),
        pl.BlockSpec((med, 1), lambda i: (0, 0)),
        pl.BlockSpec((cout, med), lambda i: (0, 0)),
        pl.BlockSpec((cout, 1), lambda i: (0, 0)),
    ]
    if res_conv:
        wrf, br = _fold_bn(p["convr_w"][:, :, 0, 0], *p["bnr"])        # (cout, cin)
        args += [wrf.astype(cdt), br]
        in_specs += [pl.BlockSpec((cout, cin), lambda i: (0, 0)),
                     pl.BlockSpec((cout, 1), lambda i: (0, 0))]
    else:
        assert cin == cout, "identity residual requires inplanes == outplanes"

    budget = _vmem_budget_bytes()
    step_bytes = functools.partial(_step_vmem_bytes, cin=cin, med=med, cout=cout,
                                   hw=hw, isz=isz, emit_x2=return_x_2,
                                   res_conv=res_conv)
    n_img = _pick_images_per_step(N, step_bytes, budget)
    assert N % n_img == 0
    in_specs[0] = pl.BlockSpec((n_img, cin, hw), lambda i: (i, 0, 0))

    out_specs = pl.BlockSpec((n_img, cout, hw), lambda i: (i, 0, 0))
    out_shape = jax.ShapeDtypeStruct((N, cout, hw), cdt)
    if return_x_2:
        out_specs = [out_specs,
                     pl.BlockSpec((n_img, med, hw), lambda i: (i, 0, 0))]
        out_shape = [out_shape, jax.ShapeDtypeStruct((N, med, hw), cdt)]

    kernel = functools.partial(_conv_block_kernel, H=H, W=W, n_img=n_img,
                               res_conv=res_conv, emit_x2=return_x_2)
    result = pl.pallas_call(
        kernel,
        out_shape=out_shape,
        grid=(N // n_img,),
        in_specs=in_specs,
        out_specs=out_specs,
        scratch_shapes=[pltpu.VMEM((9 * med, hw), cdt)],
        compiler_params=pltpu.CompilerParams(
            dimension_semantics=("parallel",),
            vmem_limit_bytes=budget),
    )(*args)

    if return_x_2:
        out_rows, x2_rows = result
        return (out_rows.reshape(N, cout, H, W), x2_rows.reshape(N, med, H, W))
    return result.reshape(N, cout, H, W)


# ----------------------------- pure-JAX reference ----------------------------

def conv_block_forward_ref(x, p, *, res_conv=False):
    def conv(x, w, stride=1, padding=0):
        return lax.conv_general_dilated(
            x, w, (stride, stride), [(padding, padding)] * 2,
            dimension_numbers=("NCHW", "OIHW", "NCHW"))

    def bn(x, params):
        gamma, beta, mean, var = params
        inv = gamma / jnp.sqrt(var + EPS)
        return (x * inv[None, :, None, None]
                + (beta - mean * inv)[None, :, None, None])

    residual = x
    h = jax.nn.relu(bn(conv(x, p["conv1_w"]), p["bn1"]))
    h = conv(h, p["conv2_w"], padding=1)
    x2 = jax.nn.relu(bn(h, p["bn2"]))
    h = bn(conv(x2, p["conv3_w"]), p["bn3"])
    if res_conv:
        residual = bn(conv(x, p["convr_w"]), p["bnr"])
    out = jax.nn.relu(h + residual)
    return out, x2


# ----------------------------- demo -----------------------------------------

if __name__ == "__main__":
    key = jax.random.PRNGKey(0)
    k_x, k_xb, k_p1, k_p2 = jax.random.split(key, 4)

    N, H, W = 2, 16, 16

    # Config A: ConvBlock(inplanes=16, outplanes=16) -> identity residual
    inplanes, outplanes = 16, 16
    x = jax.random.normal(k_x, (N, inplanes, H, W), jnp.float32)
    params = init_params(k_p1, inplanes, outplanes, res_conv=False)
    ref_out, ref_x2 = conv_block_forward_ref(x, params, res_conv=False)

    # f32 path: tight correctness check.
    out, x2 = conv_block_forward_pallas(x, params, res_conv=False,
                                        compute_dtype=jnp.float32)
    out, x2 = jax.block_until_ready((out, x2))
    assert out.shape == (N, outplanes, H, W)
    assert x2.shape == (N, outplanes // 4, H, W)
    assert jnp.allclose(out, ref_out, atol=1e-4, rtol=1e-4)
    assert jnp.allclose(x2, ref_x2, atol=1e-4, rtol=1e-4)

    # bf16 I/O path (f32 accumulation): loose tolerance appropriate for bf16.
    out16, x216 = conv_block_forward_pallas(x, params, res_conv=False,
                                            compute_dtype=jnp.bfloat16)
    out16, x216 = jax.block_until_ready((out16, x216))
    assert jnp.allclose(out16.astype(jnp.float32), ref_out, atol=1e-1, rtol=1e-1)
    assert jnp.allclose(x216.astype(jnp.float32), ref_x2, atol=1e-1, rtol=1e-1)

    # Config B: res_conv=True (projection residual), inplanes != outplanes
    inplanes_b, outplanes_b = 8, 16
    xb = jax.random.normal(k_xb, (N, inplanes_b, H, W), jnp.float32)
    params_b = init_params(k_p2, inplanes_b, outplanes_b, res_conv=True)
    ref_out_b, ref_x2_b = conv_block_forward_ref(xb, params_b, res_conv=True)

    out_b, x2_b = conv_block_forward_pallas(xb, params_b, res_conv=True,
                                            compute_dtype=jnp.float32)
    out_b, x2_b = jax.block_until_ready((out_b, x2_b))
    assert jnp.allclose(out_b, ref_out_b, atol=1e-4, rtol=1e-4)
    assert jnp.allclose(x2_b, ref_x2_b, atol=1e-4, rtol=1e-4)

    out_b16, x2_b16 = conv_block_forward_pallas(xb, params_b, res_conv=True,
                                                compute_dtype=jnp.bfloat16)
    out_b16 = jax.block_until_ready(out_b16)
    assert jnp.allclose(out_b16.astype(jnp.float32), ref_out_b, atol=1e-1, rtol=1e-1)

    # return_x_2=False path (single output, x2 never written to HBM).
    out_only = conv_block_forward_pallas(x, params, res_conv=False,
                                         return_x_2=False,
                                         compute_dtype=jnp.float32)
    out_only = jax.block_until_ready(out_only)
    assert jnp.allclose(out_only, ref_out, atol=1e-4, rtol=1e-4)

    print("KERNEL_OK")
</pallas_src>

<mosaic_0001>
module attributes {stable_mosaic.version = 11 : i64} {
  func.func @_conv_block_kernel(%arg0: i32, %arg1: memref<1x16x256xf32, #tpu.memory_space<vmem>>, %arg2: memref<4x16xf32, #tpu.memory_space<vmem>>, %arg3: memref<4x1xf32, #tpu.memory_space<vmem>>, %arg4: memref<4x36xf32, #tpu.memory_space<vmem>>, %arg5: memref<4x1xf32, #tpu.memory_space<vmem>>, %arg6: memref<16x4xf32, #tpu.memory_space<vmem>>, %arg7: memref<16x1xf32, #tpu.memory_space<vmem>>, %arg8: memref<1x16x256xf32, #tpu.memory_space<vmem>>, %arg9: memref<1x4x256xf32, #tpu.memory_space<vmem>>, %arg10: memref<36x256xf32, #tpu.memory_space<vmem>>) attributes {dimension_semantics = [#tpu.dimension_semantics<parallel>], iteration_bounds = array<i64: 2>, scalar_prefetch = 0 : i64, scratch_operands = 1 : i64, tpu.core_type = #tpu.core_type<tc>, window_params = [{transform_indices = @transform_0, window_bounds = array<i64: 1, 16, 256>}, {pipeline_mode = #tpu.pipeline_mode<synchronous>, transform_indices = @transform_1, window_bounds = array<i64: 4, 16>}, {pipeline_mode = #tpu.pipeline_mode<synchronous>, transform_indices = @transform_2, window_bounds = array<i64: 4, 1>}, {pipeline_mode = #tpu.pipeline_mode<synchronous>, transform_indices = @transform_3, window_bounds = array<i64: 4, 36>}, {pipeline_mode = #tpu.pipeline_mode<synchronous>, transform_indices = @transform_4, window_bounds = array<i64: 4, 1>}, {pipeline_mode = #tpu.pipeline_mode<synchronous>, transform_indices = @transform_5, window_bounds = array<i64: 16, 4>}, {pipeline_mode = #tpu.pipeline_mode<synchronous>, transform_indices = @transform_6, window_bounds = array<i64: 16, 1>}, {transform_indices = @transform_7, window_bounds = array<i64: 1, 16, 256>}, {transform_indices = @transform_8, window_bounds = array<i64: 1, 4, 256>}]} {
    %c0 = arith.constant 0 : index
    %c0_0 = arith.constant 0 : index
    %0 = vector.load %arg2[%c0, %c0_0] : memref<4x16xf32, #tpu.memory_space<vmem>>, vector<4x16xf32>
    %c0_1 = arith.constant 0 : index
    %c0_2 = arith.constant 0 : index
    %1 = vector.load %arg3[%c0_1, %c0_2] : memref<4x1xf32, #tpu.memory_space<vmem>>, vector<4x1xf32>
    %c0_3 = arith.constant 0 : index
    %c0_4 = arith.constant 0 : index
    %2 = vector.load %arg4[%c0_3, %c0_4] : memref<4x36xf32, #tpu.memory_space<vmem>>, vector<4x36xf32>
    %c0_5 = arith.constant 0 : index
    %c0_6 = arith.constant 0 : index
    %3 = vector.load %arg5[%c0_5, %c0_6] : memref<4x1xf32, #tpu.memory_space<vmem>>, vector<4x1xf32>
    %c0_7 = arith.constant 0 : index
    %c0_8 = arith.constant 0 : index
    %4 = vector.load %arg6[%c0_7, %c0_8] : memref<16x4xf32, #tpu.memory_space<vmem>>, vector<16x4xf32>
    %c0_9 = arith.constant 0 : index
    %c0_10 = arith.constant 0 : index
    %5 = vector.load %arg7[%c0_9, %c0_10] : memref<16x1xf32, #tpu.memory_space<vmem>>, vector<16x1xf32>
    %6 = tpu.iota {dimensions = array<i32: 1>} : vector<4x256xi32>
    %c15_i32 = arith.constant 15 : i32
    %7 = vector.broadcast %c15_i32 : i32 to vector<4x256xi32>
    %8 = arith.andi %6, %7 : vector<4x256xi32>
    %c0_11 = arith.constant 0 : index
    %c0_12 = arith.constant 0 : index
    %c0_13 = arith.constant 0 : index
    %9 = vector.load %arg1[%c0_11, %c0_12, %c0_13] : memref<1x16x256xf32, #tpu.memory_space<vmem>>, vector<1x16x256xf32>
    %10 = vector.shape_cast %9 : vector<1x16x256xf32> to vector<16x256xf32>
    %cst = arith.constant dense<0.000000e+00> : vector<4x256xf32>
    %11 = tpu.matmul %0, %10, %cst {dimension_numbers = #tpu.dot_dimension_numbers<[1], [0], [0], [1], [0, 0, 1, 1], [], []>} : vector<4x16xf32>, vector<16x256xf32>, vector<4x256xf32> -> vector<4x256xf32>
    %12 = vector.broadcast %1 : vector<4x1xf32> to vector<4x256xf32>
    %13 = arith.addf %11, %12 : vector<4x256xf32>
    %cst_14 = arith.constant 0.000000e+00 : f32
    %14 = vector.broadcast %cst_14 : f32 to vector<4x256xf32>
    %15 = arith.maximumf %13, %14 : vector<4x256xf32>
    %c17_i32 = arith.constant 17 : i32
    %16 = tpu.dynamic_rotate %15 by %c17_i32 dim 1 : vector<4x256xf32>, i32 -> vector<4x256xf32>
    %c16_i32 = arith.constant 16 : i32
    %17 = vector.broadcast %c16_i32 : i32 to vector<4x256xi32>
    %18 = arith.cmpi sge, %6, %17 : vector<4x256xi32>
    %c1_i32 = arith.constant 1 : i32
    %19 = vector.broadcast %c1_i32 : i32 to vector<4x256xi32>
    %20 = arith.cmpi sge, %8, %19 : vector<4x256xi32>
    %21 = arith.andi %18, %20 : vector<4x256xi1>
    %cst_15 = arith.constant 0.000000e+00 : f32
    %22 = vector.broadcast %cst_15 : f32 to vector<4x256xf32>
    %23 = arith.select %21, %16, %22 : vector<4x256xi1>, vector<4x256xf32>
    %c0_16 = arith.constant 0 : index
    %c0_17 = arith.constant 0 : index
    %24 = vector.load %arg10[%c0_16, %c0_17] : memref<36x256xf32, #tpu.memory_space<vmem>>, vector<4x256xf32>
    tpu.vector_store %arg10[%c0_16, %c0_17], %23 {strides = array<i32>} : memref<36x256xf32, #tpu.memory_space<vmem>>, vector<4x256xf32>,
    %c16_i32_18 = arith.constant 16 : i32
    %25 = tpu.dynamic_rotate %15 by %c16_i32_18 dim 1 : vector<4x256xf32>, i32 -> vector<4x256xf32>
    %c16_i32_19 = arith.constant 16 : i32
    %26 = vector.broadcast %c16_i32_19 : i32 to vector<4x256xi32>
    %27 = arith.cmpi sge, %6, %26 : vector<4x256xi32>
    %cst_20 = arith.constant 0.000000e+00 : f32
    %28 = vector.broadcast %cst_20 : f32 to vector<4x256xf32>
    %29 = arith.select %27, %25, %28 : vector<4x256xi1>, vector<4x256xf32>
    %c4 = arith.constant 4 : index
    %c0_21 = arith.constant 0 : index
    %30 = vector.load %arg10[%c4, %c0_21] : memref<36x256xf32, #tpu.memory_space<vmem>>, vector<4x256xf32>
    tpu.vector_store %arg10[%c4, %c0_21], %29 {strides = array<i32>} : memref<36x256xf32, #tpu.memory_space<vmem>>, vector<4x256xf32>,
    %c15_i32_22 = arith.constant 15 : i32
    %31 = tpu.dynamic_rotate %15 by %c15_i32_22 dim 1 : vector<4x256xf32>, i32 -> vector<4x256xf32>
    %c16_i32_23 = arith.constant 16 : i32
    %32 = vector.broadcast %c16_i32_23 : i32 to vector<4x256xi32>
    %33 = arith.cmpi sge, %6, %32 : vector<4x256xi32>
    %c14_i32 = arith.constant 14 : i32
    %34 = vector.broadcast %c14_i32 : i32 to vector<4x256xi32>
    %35 = arith.cmpi sle, %8, %34 : vector<4x256xi32>
    %36 = arith.andi %33, %35 : vector<4x256xi1>
    %cst_24 = arith.constant 0.000000e+00 : f32
    %37 = vector.broadcast %cst_24 : f32 to vector<4x256xf32>
    %38 = arith.select %36, %31, %37 : vector<4x256xi1>, vector<4x256xf32>
    %c8 = arith.constant 8 : index
    %c0_25 = arith.constant 0 : index
    %39 = vector.load %arg10[%c8, %c0_25] : memref<36x256xf32, #tpu.memory_space<vmem>>, vector<4x256xf32>
    tpu.vector_store %arg10[%c8, %c0_25], %38 {strides = array<i32>} : memref<36x256xf32, #tpu.memory_space<vmem>>, vector<4x256xf32>,
    %c1_i32_26 = arith.constant 1 : i32
    %40 = tpu.dynamic_rotate %15 by %c1_i32_26 dim 1 : vector<4x256xf32>, i32 -> vector<4x256xf32>
    %c1_i32_27 = arith.constant 1 : i32
    %41 = vector.broadcast %c1_i32_27 : i32 to vector<4x256xi32>
    %42 = arith.cmpi sge, %8, %41 : vector<4x256xi32>
    %cst_28 = arith.constant 0.000000e+00 : f32
    %43 = vector.broadcast %cst_28 : f32 to vector<4x256xf32>
    %44 = arith.select %42, %40, %43 : vector<4x256xi1>, vector<4x256xf32>
    %c12 = arith.constant 12 : index
    %c0_29 = arith.constant 0 : index
    %45 = vector.load %arg10[%c12, %c0_29] : memref<36x256xf32, #tpu.memory_space<vmem>>, vector<4x256xf32>
    tpu.vector_store %arg10[%c12, %c0_29], %44 {strides = array<i32>} : memref<36x256xf32, #tpu.memory_space<vmem>>, vector<4x256xf32>,
    %c16 = arith.constant 16 : index
    %c0_30 = arith.constant 0 : index
    %46 = vector.load %arg10[%c16, %c0_30] : memref<36x256xf32, #tpu.memory_space<vmem>>, vector<4x256xf32>
    tpu.vector_store %arg10[%c16, %c0_30], %15 {strides = array<i32>} : memref<36x256xf32, #tpu.memory_space<vmem>>, vector<4x256xf32>,
    %c255_i32 = arith.constant 255 : i32
    %47 = tpu.dynamic_rotate %15 by %c255_i32 dim 1 : vector<4x256xf32>, i32 -> vector<4x256xf32>
    %c14_i32_31 = arith.constant 14 : i32
    %48 = vector.broadcast %c14_i32_31 : i32 to vector<4x256xi32>
    %49 = arith.cmpi sle, %8, %48 : vector<4x256xi32>
    %cst_32 = arith.constant 0.000000e+00 : f32
    %50 = vector.broadcast %cst_32 : f32 to vector<4x256xf32>
    %51 = arith.select %49, %47, %50 : vector<4x256xi1>, vector<4x256xf32>
    %c20 = arith.constant 20 : index
    %c0_33 = arith.constant 0 : index
    %52 = vector.load %arg10[%c20, %c0_33] : memref<36x256xf32, #tpu.memory_space<vmem>>, vector<4x256xf32>
    tpu.vector_store %arg10[%c20, %c0_33], %51 {strides = array<i32>} : memref<36x256xf32, #tpu.memory_space<vmem>>, vector<4x256xf32>,
    %c241_i32 = arith.constant 241 : i32
    %53 = tpu.dynamic_rotate %15 by %c241_i32 dim 1 : vector<4x256xf32>, i32 -> vector<4x256xf32>
    %c240_i32 = arith.constant 240 : i32
    %54 = vector.broadcast %c240_i32 : i32 to vector<4x256xi32>
    %55 = arith.cmpi slt, %6, %54 : vector<4x256xi32>
    %c1_i32_34 = arith.constant 1 : i32
    %56 = vector.broadcast %c1_i32_34 : i32 to vector<4x256xi32>
    %57 = arith.cmpi sge, %8, %56 : vector<4x256xi32>
    %58 = arith.andi %55, %57 : vector<4x256xi1>
    %cst_35 = arith.constant 0.000000e+00 : f32
    %59 = vector.broadcast %cst_35 : f32 to vector<4x256xf32>
    %60 = arith.select %58, %53, %59 : vector<4x256xi1>, vector<4x256xf32>
    %c24 = arith.constant 24 : index
    %c0_36 = arith.constant 0 : index
    %61 = vector.load %arg10[%c24, %c0_36] : memref<36x256xf32, #tpu.memory_space<vmem>>, vector<4x256xf32>
    tpu.vector_store %arg10[%c24, %c0_36], %60 {strides = array<i32>} : memref<36x256xf32, #tpu.memory_space<vmem>>, vector<4x256xf32>,
    %c240_i32_37 = arith.constant 240 : i32
    %62 = tpu.dynamic_rotate %15 by %c240_i32_37 dim 1 : vector<4x256xf32>, i32 -> vector<4x256xf32>
    %c240_i32_38 = arith.constant 240 : i32
    %63 = vector.broadcast %c240_i32_38 : i32 to vector<4x256xi32>
    %64 = arith.cmpi slt, %6, %63 : vector<4x256xi32>
    %cst_39 = arith.constant 0.000000e+00 : f32
    %65 = vector.broadcast %cst_39 : f32 to vector<4x256xf32>
    %66 = arith.select %64, %62, %65 : vector<4x256xi1>, vector<4x256xf32>
    %c28 = arith.constant 28 : index
    %c0_40 = arith.constant 0 : index
    %67 = vector.load %arg10[%c28, %c0_40] : memref<36x256xf32, #tpu.memory_space<vmem>>, vector<4x256xf32>
    tpu.vector_store %arg10[%c28, %c0_40], %66 {strides = array<i32>} : memref<36x256xf32, #tpu.memory_space<vmem>>, vector<4x256xf32>,
    %c239_i32 = arith.constant 239 : i32
    %68 = tpu.dynamic_rotate %15 by %c239_i32 dim 1 : vector<4x256xf32>, i32 -> vector<4x256xf32>
    %c240_i32_41 = arith.constant 240 : i32
    %69 = vector.broadcast %c240_i32_41 : i32 to vector<4x256xi32>
    %70 = arith.cmpi slt, %6, %69 : vector<4x256xi32>
    %c14_i32_42 = arith.constant 14 : i32
    %71 = vector.broadcast %c14_i32_42 : i32 to vector<4x256xi32>
    %72 = arith.cmpi sle, %8, %71 : vector<4x256xi32>
    %73 = arith.andi %70, %72 : vector<4x256xi1>
    %cst_43 = arith.constant 0.000000e+00 : f32
    %74 = vector.broadcast %cst_43 : f32 to vector<4x256xf32>
    %75 = arith.select %73, %68, %74 : vector<4x256xi1>, vector<4x256xf32>
    %c32 = arith.constant 32 : index
    %c0_44 = arith.constant 0 : index
    %76 = vector.load %arg10[%c32, %c0_44] : memref<36x256xf32, #tpu.memory_space<vmem>>, vector<4x256xf32>
    tpu.vector_store %arg10[%c32, %c0_44], %75 {strides = array<i32>} : memref<36x256xf32, #tpu.memory_space<vmem>>, vector<4x256xf32>,
    %c0_45 = arith.constant 0 : index
    %c0_46 = arith.constant 0 : index
    %77 = vector.load %arg10[%c0_45, %c0_46] : memref<36x256xf32, #tpu.memory_space<vmem>>, vector<36x256xf32>
    %cst_47 = arith.constant dense<0.000000e+00> : vector<4x256xf32>
    %78 = tpu.matmul %2, %77, %cst_47 {dimension_numbers = #tpu.dot_dimension_numbers<[1], [0], [0], [1], [0, 0, 1, 1], [], []>} : vector<4x36xf32>, vector<36x256xf32>, vector<4x256xf32> -> vector<4x256xf32>
    %79 = vector.broadcast %3 : vector<4x1xf32> to vector<4x256xf32>
    %80 = arith.addf %78, %79 : vector<4x256xf32>
    %cst_48 = arith.constant 0.000000e+00 : f32
    %81 = vector.broadcast %cst_48 : f32 to vector<4x256xf32>
    %82 = arith.maximumf %80, %81 : vector<4x256xf32>
    %c0_49 = arith.constant 0 : index
    %c0_50 = arith.constant 0 : index
    %c0_51 = arith.constant 0 : index
    %83 = vector.load %arg9[%c0_49, %c0_50, %c0_51] : memref<1x4x256xf32, #tpu.memory_space<vmem>>, vector<1x4x256xf32>
    %84 = vector.shape_cast %83 : vector<1x4x256xf32> to vector<4x256xf32>
    %85 = vector.shape_cast %82 : vector<4x256xf32> to vector<1x4x256xf32>
    tpu.vector_store %arg9[%c0_49, %c0_50, %c0_51], %85 {strides = array<i32>} : memref<1x4x256xf32, #tpu.memory_space<vmem>>, vector<1x4x256xf32>,
    %cst_52 = arith.constant dense<0.000000e+00> : vector<16x256xf32>
    %86 = tpu.matmul %4, %82, %cst_52 {dimension_numbers = #tpu.dot_dimension_numbers<[1], [0], [0], [1], [0, 0, 1, 1], [], []>} : vector<16x4xf32>, vector<4x256xf32>, vector<16x256xf32> -> vector<16x256xf32>
    %87 = vector.broadcast %5 : vector<16x1xf32> to vector<16x256xf32>
    %88 = arith.addf %86, %87 : vector<16x256xf32>
    %89 = arith.addf %88, %10 : vector<16x256xf32>
    %cst_53 = arith.constant 0.000000e+00 : f32
    %90 = vector.broadcast %cst_53 : f32 to vector<16x256xf32>
    %91 = arith.maximumf %89, %90 : vector<16x256xf32>
    %c0_54 = arith.constant 0 : index
    %c0_55 = arith.constant 0 : index
    %c0_56 = arith.constant 0 : index
    %92 = vector.load %arg8[%c0_54, %c0_55, %c0_56] : memref<1x16x256xf32, #tpu.memory_space<vmem>>, vector<1x16x256xf32>
    %93 = vector.shape_cast %92 : vector<1x16x256xf32> to vector<16x256xf32>
    %94 = vector.shape_cast %91 : vector<16x256xf32> to vector<1x16x256xf32>
    tpu.vector_store %arg8[%c0_54, %c0_55, %c0_56], %94 {strides = array<i32>} : memref<1x16x256xf32, #tpu.memory_space<vmem>>, vector<1x16x256xf32>,
    return
  }
  func.func @transform_0(%arg0: i32) -> (i32, i32, i32) {
    %c0_i32 = arith.constant 0 : i32
    %c0_i32_0 = arith.constant 0 : i32
    %c0_i32_1 = arith.constant 0 : i32
    return %arg0, %c0_i32, %c0_i32_0 : i32, i32, i32
  }
  func.func @transform_1(%arg0: i32) -> (i32, i32) {
    %c0_i32 = arith.constant 0 : i32
    %c0_i32_0 = arith.constant 0 : i32
    %c0_i32_1 = arith.constant 0 : i32
    return %c0_i32, %c0_i32_0 : i32, i32
  }
  func.func @transform_2(%arg0: i32) -> (i32, i32) {
    %c0_i32 = arith.constant 0 : i32
    %c0_i32_0 = arith.constant 0 : i32
    %c0_i32_1 = arith.constant 0 : i32
    return %c0_i32, %c0_i32_0 : i32, i32
  }
  func.func @transform_3(%arg0: i32) -> (i32, i32) {
    %c0_i32 = arith.constant 0 : i32
    %c0_i32_0 = arith.constant 0 : i32
    %c0_i32_1 = arith.constant 0 : i32
    return %c0_i32, %c0_i32_0 : i32, i32
  }
  func.func @transform_4(%arg0: i32) -> (i32, i32) {
    %c0_i32 = arith.constant 0 : i32
    %c0_i32_0 = arith.constant 0 : i32
    %c0_i32_1 = arith.constant 0 : i32
    return %c0_i32, %c0_i32_0 : i32, i32
  }
  func.func @transform_5(%arg0: i32) -> (i32, i32) {
    %c0_i32 = arith.constant 0 : i32
    %c0_i32_0 = arith.constant 0 : i32
    %c0_i32_1 = arith.constant 0 : i32
    return %c0_i32, %c0_i32_0 : i32, i32
  }
  func.func @transform_6(%arg0: i32) -> (i32, i32) {
    %c0_i32 = arith.constant 0 : i32
    %c0_i32_0 = arith.constant 0 : i32
    %c0_i32_1 = arith.constant 0 : i32
    return %c0_i32, %c0_i32_0 : i32, i32
  }
  func.func @transform_7(%arg0: i32) -> (i32, i32, i32) {
    %c0_i32 = arith.constant 0 : i32
    %c0_i32_0 = arith.constant 0 : i32
    %c0_i32_1 = arith.constant 0 : i32
    return %arg0, %c0_i32, %c0_i32_0 : i32, i32, i32
  }
  func.func @transform_8(%arg0: i32) -> (i32, i32, i32) {
    %c0_i32 = arith.constant 0 : i32
    %c0_i32_0 = arith.constant 0 : i32
    %c0_i32_1 = arith.constant 0 : i32
    return %arg0, %c0_i32, %c0_i32_0 : i32, i32, i32
  }
}

</mosaic_0001>

<bundles_post_ra>
// kernel: tpu_custom_call.1
= control target key start
LH: loop header
LB: loop body
LE: loop exit
PB: predicated region body
PF: predicated region fallthrough
CT: control target
= control target key end

     0   :  { %14 = vsyncpa [#allocation4], 0  ;;  %s1496_s0 = inlined_call_operand.hbm [shape: f32[2,16,256], index: 0, kind: input, shape index: {}]   ;;  %s1497_s1 = inlined_call_operand.vmem [shape: f32[4,16], index: 1, kind: input, shape index: {}]   ;;  %s1498_s2 = inlined_call_operand.vmem [shape: f32[4,1], index: 2, kind: input, shape index: {}]   ;;  %s1499_s3 = inlined_call_operand.vmem [shape: f32[4,36], index: 3, kind: input, shape index: {}]   ;;  %s1500_s4 = inlined_call_operand.vmem [shape: f32[4,1], index: 4, kind: input, shape index: {}]   ;;  %s1501_s5 = inlined_call_operand.vmem [shape: f32[16,4], index: 5, kind: input, shape index: {}]   ;;  %s1502_s6 = inlined_call_operand.vmem [shape: f32[16,1], index: 6, kind: input, shape index: {}]   ;;  %s1503_s7 = inlined_call_operand.hbm [shape: f32[2,16,256], index: 7, kind: output, shape index: {0}]   ;;  %s1504_s8 = inlined_call_operand.hbm [shape: f32[2,4,256], index: 8, kind: output, shape index: {1}]  }
   0x1   :  { %16 = vsyncpa [#allocation4 + $0x1], 0 }
   0x2   :  { %17 = vsyncpa [#allocation5], 0 }
   0x3   :  { %19 = vsyncpa [#allocation5 + $0x1], 0 }
   0x4   :  { %20 = vsyncpa [#allocation8], 0 }
   0x5   :  { %22 = vsyncpa [#allocation8 + $0x1], 0  ;;  %s1196_s27 = smov 0   ;;  %s1198_s28 = smov 0  }
   0x6   :  { %s1200_s29 = smov 0   ;;  %s1202_s30 = smov 0  }
   0x7 LB: > { %s1217_s9 = sadd.s32 4294967295, %s1133_s30   ;;  %s916_s10 = sadd.s32 4294967294, %s1133_s30   ;;  %s1133_s30 = sphi %s1202_s30, %s1533_s30   ;;  %s1129_s29 = sphi %s1200_s29, %s1532_s29   ;;  %s1125_s28 = sphi %s1198_s28, %s1531_s28   ;;  %s1121_s27 = sphi %s1196_s27, %s1530_s27  }
   0x8   : > { %s1221_s11 = sadd.s32 1, %s1133_s30   ;;  %s35_s12 = sadd.s32 1, %s1129_s29 }
   0x9   : > { %s32_s13 = ssub.s32 %s1133_s30, %s1221_s11  ;;  %p42_p0 = scmp.ne.s32.totalorder %s1129_s29, %s1125_s28 }
   0xa   : > { %p33_p1 = scmp.eq.s32.totalorder %s32_s13, 0  ;;  %p43_p2 = scmp.eq.s32.totalorder %s1133_s30, 0 }
   0xb   : > { %p48_p3 = scmp.ne.s32.totalorder %s1125_s28, %s1121_s27  ;;  %p49_p4 = scmp.eq.s32.totalorder %s1217_s9, 0 }
   0xc   : > { %s1233_s14 = scalar_select %p33_p1, %s1129_s29, %s35_s12  }
   0xd   : > { %p1235_p5 = por %p43_p2, %p42_p0  ;;  %p1239_p6 = por %p49_p4, %p48_p3 }
   0xe   : > { %1509 = sst [smem:[#allocation12_spill]] %s1233_s14  ;;  %p198_p7 = scmp.eq.s32.totalorder %s1217_s9, 1 }
   0xf   : > { %s1511_s16 = scalar_select %p1239_p6, 1, 0 }
  0x10   : > { %p204_p8 = scmp.eq.s32.totalorder %s916_s10, 1  ;;  %p962_p10 = scmp.lt.s32.totalorder %s1133_s30, 2 }
  0x11   : > { %p1246_p11 = por %p198_p7, %p42_p0  ;;  %s268_s19 = sand.u32 1, %s1129_s29  }
  0x12   : > { %p1250_p12 = por %p204_p8, %p48_p3  ;;  %s942_s20 = sshll.u32 %s1133_s30, 9 }
  0x13   : > { %s1512_s17 = scalar_select %p1246_p11, 1, 0 }
  0x14   : > { %s1513_s18 = scalar_select %p1250_p12, 1, 0 }
  0x15   : > { %s919_s21 = sshll.u32 %s268_s19, 5  ;;  %s1259_s24 = scalar_lea.hbm %s1496_s0, %s942_s20 }
  0x16   : > { %s272_s25 = scalar_lea.vmem [#allocation3], %s919_s21  ;;  %p1263_p13 = pnand %p962_p10, %p1235_p5 }
  0x17   : > { %s279_s26 = sshll.u32 %s272_s25, 4  ;;  %s1269_s12 = scalar_lea.sflag [#allocation4], %s268_s19  ;;  %s1267_s26 = int_to_ptr.vmem [resolvable:$true] %s279_s26 }
  0x18   : > { %s1011_s13 = scalar_lea.hbm %s1259_s24, 512  ;;  %p1013_p1 = pneg %p1263_p13 }
  0x19   : > { %p1012_p0 = scmp.ne.s32.totalorder %s1259_s24, %s1011_s13  ;;  %s1016_s21 = scalar_lea.hbm %s1496_s0, 1024 }
  0x1a   : > { %p1017_p4 = scmp.lt.s32.totalorder %s1259_s24, %s1496_s0  ;;  %p1018_p5 = scmp.lt.s32.totalorder %s1016_s21, %s1011_s13 }
  0x1b   : > { %p1014_p2 = pnand %p1013_p1, %p1012_p0 }
  0x1c   : > { %p1019_p7 = por %p1018_p5, %p1017_p4 }
  0x1d   : > { %p1015_p3 = pneg %p1014_p2 }
  0x1f   : > { %p1020_p8 = pnand %p1019_p7, %p1015_p3 }
  0x21   : > { %1023 = shalt.err (!%p1020_p8)
}
  0x22   : > { %s1024_s19 = scalar_lea.vmem %s1267_s26, 512  ;;  %s1135_s25 = smov [#allocation3]  }
  0x23   : > { %p1025_p10 = scmp.ne.s32.totalorder %s1267_s26, %s1024_s19  ;;  %s1029_s14 = sshll.u32 %s1135_s25, 4  ;;  %s1030_s14 = int_to_ptr.vmem [resolvable:$false] %s1029_s14 }
  0x24   : > { %s1031_s20 = scalar_lea.vmem %s1030_s14, 1024  ;;  %p1032_p2 = scmp.lt.s32.totalorder %s1267_s26, %s1030_s14 }
  0x25   : > { %p1027_p9 = pnand %p1025_p10, %p1013_p1  ;;  %p1033_p12 = scmp.lt.s32.totalorder %s1031_s20, %s1024_s19 }
  0x27   : > { %p1028_p0 = pneg %p1027_p9  ;;  %p1034_p11 = por %p1033_p12, %p1032_p2 }
  0x29   : > { %p1035_p6 = pnand %p1034_p11, %p1028_p0 }
  0x2b   : > { %1038 = shalt.err (!%p1035_p6)
}
  0x2c   : > { %s1136_s13 = smov 256   ;;  %s1137_s22 = smov 16  }
  0x2d   : > { %954 = dma.hbm_to_vmem [thread:$0]  (!%p1263_p13), %s1259_s24, 512, %s1267_s26, %s1269_s12, %s1136_s13, %s1136_s13, %s1137_s22  }
  0x2e   : > { %p922_p9 = scmp.ge.s32.totalorder %s1133_s30, 1  ;;  %p287_p1 = scmp.lt.s32.totalorder %s1133_s30, 3 }
  0x30   : > { %p288_p3 = pnand %p922_p9, %p287_p1 }
  0x31   : > { %s1293_s14 = sand.u32 (!%p288_p3), 1, %s1125_s28   ;;  %p1515_p6 = scmp.ne.s32.totalorder (!%p288_p3), %s1511_s16, 0 }
  0x32   : > { %291 = sbr.rel (%p288_p3) target bundleno = 835 (0x343), region = 48  ;;  %s1508_s21 = sshll.u32 (!%p288_p3), %s1293_s14, 5 }
  0x33   : > { %s294_s15 = scalar_lea.sflag (!%p288_p3), [#allocation4], %s1293_s14  ;;  %s297_s23 = scalar_lea.vmem (!%p288_p3), [#allocation3], %s1508_s21 }
  0x37   : > { %1108 = dma.done.wait (%p1515_p6), %s294_s15, 512  }
  0x38   : > { %1110 = vsyncadd (%p1515_p6), %s294_s15, 4294966784  ;;  %v1138_v0 = vmov 0.0   ;;  %v1139_v1 = vmov 0   ;;  %v1305_v2 = vld [vmem:[%s297_s23 + $0x18] sm:$0xff]  ;;  %v1307_v3 = vld [vmem:[%s297_s23 + $0x10] sm:$0xff]  ;;  %vm357_vm0 = vcmask 130048   ;;  %v343_v18 = vlaneseq }
  0x39   : > { %425 = vmatprep.mubr.f32.mxu0 %v1138_v0  ;;  %1009 = vset.pattern.permute.xlu0 %v1139_v1  ;;  %v1309_v4 = vld [vmem:[%s297_s23 + $0x8] sm:$0xff]  ;;  %v1312_v5 = vld [vmem:[%s297_s23] sm:$0xff]  ;;  %v336_v6 = vld [vmem:[%s1498_s2] sm:$0xf]  ;;  %s1140_s12 = smov 111   ;;  %s1141_s19 = smov 112  }
  0x3a   : > { %654 = vmatprep.mubr.f32.mxu1 %v1138_v0  ;;  %1010 = vset.pattern.permute.xlu1 %v1139_v1  ;;  %v335_v7 = vld [vmem:[%s1497_s1] sm:$0xf]  ;;  %s1142_s25 = smov 127   ;;  %s1143_s20 = smov 113   ;;  %v342_v17 = vld [vmem:[%s1502_s6 + $0x8] sm:$0xff]  ;;  %v1335_v19 = vand.u32 127, %v343_v18 }
  0x3b   : > { %389 = vmatprep.subr.mxu0 %v1305_v2  ;;  %354 = vperm.xlu0 %1009, %v336_v6   ;;  %s1144_s13 = smov 1   ;;  %s1145_s22 = smov 15   ;;  %v341_v15 = vld [vmem:[%s1502_s6] sm:$0xff]  ;;  %vm583_vm11 = vcmask 1043456   ;;  %v340_v42 = vld [vmem:[%s1501_s5 + $0x8] sm:$0xff] }
  0x3c   : > { %390 = vmatpush1.msra.mxu0 %v1307_v3  ;;  %s1507_s15 = smov 16   ;;  %s1147_s23 = smov 17   ;;  %v338_v16 = vld [vmem:[%s1500_s4] sm:$0xf]  ;;  %v1338_v20 = vadd.s32 128, %v1335_v19  ;;  %v346_v22 = vand.u32 15, %v1335_v19 }
  0x3d   : > { %391 = vmatprep.subr.mxu0 %v1309_v4  ;;  %vm555_vm3 = vcmp.lt.s32.totalorder %v1335_v19, 111  ;;  %vm506_vm6 = vcmp.lt.s32.totalorder %v1335_v19, 127  ;;  %vm523_vm8 = vcmp.lt.s32.totalorder %v1335_v19, 113  ;;  %vm487_vm12 = vcmp.lt.s32.totalorder %v1335_v19, 1  ;;  %s944_s10 = sshll.u32 %s1217_s9, 7  ;;  %p1524_p12 = scmp.ne.s32.totalorder %s1512_s17, 0 }
  0x3e   : > { %392 = vmatpush1.msra.mxu0 %v1312_v5  ;;  %v347_v21 = vand.u32 15, %v1338_v20  ;;  %vm527_vm2 = vcmp.lt.s32.totalorder %v1338_v20, 240  ;;  %vm1348_vm4 = vcmp.le.s32.totalorder %v346_v22, 14  ;;  %vm1368_vm9 = vcmp.ge.s32.totalorder %v346_v22, 1 }
  0x3f   : > { %926 = vmatmul.mubr.msk.f32.vlgmr.msra.gmra.mxu0 %vm357_vm0, %v335_v7  ;;  %vm441_vm13 = vcmp.ge.s32.totalorder %v1335_v19, 16  ;;  %vm538_vm14 = vcmp.lt.s32.totalorder %v1335_v19, 112  ;;  %vm472_vm15 = vcmp.lt.s32.totalorder %v1335_v19, 15 }
  0x40   : > { %753 = vmatprep.mubr.f32.mxu0 %v1138_v0  ;;  %vm1342_vm1 = vcmp.le.s32.totalorder %v347_v21, 14  ;;  %vm1359_vm7 = vcmp.ge.s32.totalorder %v347_v21, 1  ;;  %vm477_vm0 = vmand %vm441_vm13, %vm1348_vm4 }
  0x41   : > { %vm559_vm5 = vmand %vm527_vm2, %vm1342_vm1 }
  0x42   : > { %vm529_vm10 = vmand %vm527_vm2, %vm1359_vm7 }
  0xb6   : > { %v355_v8 = vpop.permute.xlu0 %354 }
  0xff   : > { %v427_v9 = vpop.f32.mrf.mxu0 }
 0x100   : > { %v428_v10 = vadd.f32 %v427_v9, %v355_v8 }
 0x101   : > { %v429_v11 = vpop.f32.mrf.mxu0 }
 0x102   : > { %v432_v12 = vmax.f32 %v428_v10, 0.0  ;;  %v430_v13 = vadd.f32 %v429_v11, %v355_v8 }
 0x104   : > { %500 = vst [vmem:[#allocation2 + $0x48] sm:$0xf] %v432_v12  ;;  %v433_v14 = vmax.f32 %v430_v13, 0.0  ;;  %551 = vrot.lane.b32.xlu1 %v432_v12, %s1140_s12  ;;  %534 = vrot.lane.b32.xlu0 %v432_v12, %s1141_s19 }
 0x106   : > { %501 = vst [vmem:[#allocation2 + $0x28] sm:$0xf] %v433_v14 }
 0x108   : > { %502 = vrot.lane.b32.xlu1 %v432_v12, %s1142_s25  ;;  %553 = vrot.lane.b32.xlu0 %v433_v14, %s1140_s12 }
 0x10c   : > { %519 = vrot.lane.b32.xlu1 %v432_v12, %s1143_s20  ;;  %504 = vrot.lane.b32.xlu0 %v433_v14, %s1142_s25  ;;  %s812_s25 = scalar_lea.hbm %s1504_s8, %s944_s10 }
 0x110   : > { %483 = vrot.lane.b32.xlu1 %v432_v12, %s1144_s13  ;;  %521 = vrot.lane.b32.xlu0 %v433_v14, %s1143_s20 }
 0x114   : > { %468 = vrot.lane.b32.xlu1 %v432_v12, %s1145_s22  ;;  %485 = vrot.lane.b32.xlu0 %v433_v14, %s1144_s13  ;;  %s925_s13 = sshll.u32 %s1293_s14, 3 }
 0x115   : > { %s334_s16 = scalar_lea.vmem [#allocation7], %s925_s13  ;;  %s1148_s13 = smov [#allocation7]  }
 0x116   : > { %s814_s20 = sshll.u32 %s334_s16, 4  ;;  %s815_s20 = int_to_ptr.vmem [resolvable:$true] %s814_s20 }
 0x118   : > { %536 = vrot.lane.b32.xlu1 %v433_v14, %s1141_s19  ;;  %470 = vrot.lane.b32.xlu0 %v433_v14, %s1145_s22  ;;  %s784_s22 = scalar_lea.sflag [#allocation8], %s1293_s14 }
 0x11c   : > { %451 = vrot.lane.b32.xlu1 %v432_v12, %s1507_s15  ;;  %453 = vrot.lane.b32.xlu0 %v433_v14, %s1507_s15  ;;  %s1043_s15 = sshll.u32 %s1148_s13, 4  ;;  %s1044_s15 = int_to_ptr.vmem [resolvable:$false] %s1043_s15 }
 0x11d   : > { %s1045_s21 = scalar_lea.vmem %s1044_s15, 256  ;;  %p1046_p5 = scmp.lt.s32.totalorder %s815_s20, %s1044_s15 }
 0x120   : > { %434 = vrot.lane.b32.xlu1 %v432_v12, %s1147_s23  ;;  %436 = vrot.lane.b32.xlu0 %v433_v14, %s1147_s23  ;;  %s1039_s23 = scalar_lea.vmem %s815_s20, 128 }
 0x121   : > { %p1040_p11 = scmp.ne.s32.totalorder %s815_s20, %s1039_s23  ;;  %p1047_p7 = scmp.lt.s32.totalorder %s1045_s21, %s1039_s23 }
 0x123   : > { %p1041_p13 = pnand %p1040_p11, %p1524_p12  ;;  %p1048_p8 = por %p1047_p7, %p1046_p5 }
 0x124   : > { %670 = vperm.xlu0 %1009, %v341_v15   ;;  %576 = vperm.xlu1 %1010, %v338_v16  }
 0x125   : > { %p1042_p4 = pneg %p1041_p13 }
 0x127   : > { %p1049_p10 = pnand %p1048_p8, %p1042_p4 }
 0x128   : > { %675 = vperm.xlu1 %1010, %v342_v17  }
 0x176   : > { %v552_v23 = vpop.permute.xlu1 %551  ;;  %v535_v24 = vpop.permute.xlu0 %534 }
 0x17a   : > { %v503_v27 = vpop.permute.xlu1 %502  ;;  %v554_v28 = vpop.permute.xlu0 %553 }
 0x17b   : > { %v556_v29 = vsel %vm555_vm3, %v552_v23, %v554_v28  ;;  %v557_v30 = vsel %vm555_vm3, %v554_v28, %v552_v23  ;;  %vm455_vm3 = vcmp.lt.s32.totalorder %v1335_v19, 16 }
 0x17c   : > { %v560_v31 = vsel %vm1348_vm4, %v556_v29, 0.0  ;;  %v561_v32 = vsel %vm559_vm5, %v557_v30, 0.0  ;;  %vm678_vm5 = vcmask 31744  }
 0x17d   : > { %562 = vst [vmem:[#allocation2 + $0x40] sm:$0xf] %v560_v31  ;;  %563 = vst [vmem:[#allocation2 + $0x38] sm:$0xf] %v561_v32  ;;  %v337_v32 = vld [vmem:[%s1499_s3] sm:$0xf] }
 0x17e   : > { %v520_v33 = vpop.permute.xlu1 %519  ;;  %v505_v34 = vpop.permute.xlu0 %504 }
 0x17f   : > { %v507_v36 = vsel %vm506_vm6, %v503_v27, %v505_v34  ;;  %v508_v37 = vsel %vm506_vm6, %v505_v34, %v503_v27 }
 0x180   : > { %v509_v38 = vsel %vm1348_vm4, %v507_v36, 0.0  ;;  %v510_v39 = vsel %vm1342_vm1, %v508_v37, 0.0  ;;  %vm579_vm4 = vcmask 293888  }
 0x181   : > { %v513_v40 = vrot.slane %v509_v38, 4  ;;  %v514_v41 = vrot.slane %v510_v39, 4 }
 0x182   : > { %v484_v43 = vpop.permute.xlu1 %483  ;;  %v522_v44 = vpop.permute.xlu0 %521 }
 0x183   : > { %517 = vst [vmem:[#allocation2 + $0x48] sm:$0xf0] %v513_v40  ;;  %518 = vst [vmem:[#allocation2 + $0x28] sm:$0xf0] %v514_v41  ;;  %v524_v45 = vsel %vm523_vm8, %v520_v33, %v522_v44  ;;  %v525_v46 = vsel %vm523_vm8, %v522_v44, %v520_v33  ;;  %v339_v40 = vld [vmem:[%s1501_s5] sm:$0xff] }
 0x184   : > { %v530_v47 = vsel %vm1368_vm9, %v524_v45, 0.0  ;;  %v531_v48 = vsel %vm529_vm10, %v525_v46, 0.0  ;;  %v573_v49 = vld [vmem:[#allocation2 + $0x38] sm:$0xf]  ;;  %v572_v50 = vld [vmem:[#allocation2 + $0x40] sm:$0xf] }
 0x185   : > { %532 = vst [vmem:[#allocation2 + $0x8] sm:$0xf] %v530_v47  ;;  %533 = vst [vmem:[#allocation2 + $0x20] sm:$0xf] %v531_v48  ;;  %927 = vmatprep.subr.msk.mxu1 %vm583_vm11, %v573_v49 }
 0x186   : > { %v469_v51 = vpop.permute.xlu1 %468  ;;  %928 = vmatpush1.msk.msra.mxu1 %vm583_vm11, %v572_v50  ;;  %v486_v52 = vpop.permute.xlu0 %485 }
 0x187   : > { %v488_v53 = vsel %vm487_vm12, %v484_v43, %v486_v52  ;;  %v489_v54 = vsel %vm487_vm12, %v486_v52, %v484_v43 }
 0x188   : > { %v490_v55 = vsel %vm1368_vm9, %v489_v54, 0.0  ;;  %v491_v56 = vsel %vm1359_vm7, %v488_v53, 0.0 }
 0x189   : > { %v494_v57 = vrot.slane %v490_v55, 4  ;;  %v495_v58 = vrot.slane %v491_v56, 4 }
 0x18a   : > { %v537_v59 = vpop.permute.xlu1 %536  ;;  %v471_v60 = vpop.permute.xlu0 %470  ;;  %v569_v27 = vld [vmem:[#allocation2 + $0x28] sm:$0xff] }
 0x18b   : > { %498 = vst [vmem:[#allocation2 + $0x18] sm:$0xf0] %v494_v57  ;;  %499 = vst [vmem:[#allocation2 + $0x10] sm:$0xf0] %v495_v58  ;;  %v539_v61 = vsel %vm538_vm14, %v535_v24, %v537_v59  ;;  %v540_v62 = vsel %vm538_vm14, %v537_v59, %v535_v24  ;;  %v473_v63 = vsel %vm472_vm15, %v469_v51, %v471_v60 }
 0x18c   : > { %v474_v1 = vsel %vm472_vm15, %v471_v60, %v469_v51  ;;  %v542_v6 = vsel %vm527_vm2, %v540_v62, 0.0  ;;  %v545_v7 = vrot.slane %v539_v61, 4  ;;  %v480_v9 = vsel %vm1342_vm1, %v473_v63, 0.0  ;;  %vm445_vm1 = vmand %vm441_vm13, %vm1368_vm9 }
 0x18d   : > { %v479_v8 = vsel %vm477_vm0, %v474_v1, 0.0  ;;  %v546_v10 = vrot.slane %v542_v6, 4  ;;  %482 = vst [vmem:[#allocation2 + $0x10] sm:$0xf] %v480_v9  ;;  %vm438_vm2 = vcmp.lt.s32.totalorder %v1335_v19, 17  ;;  %v568_v19 = vld [vmem:[#allocation2 + $0x48] sm:$0xff] }
 0x18e   : > { %481 = vst [vmem:[#allocation2 + $0x18] sm:$0xf] %v479_v8  ;;  %549 = vst [vmem:[#allocation2 + $0x8] sm:$0xf0] %v545_v7  ;;  %v452_v11 = vpop.permute.xlu1 %451  ;;  %v454_v12 = vpop.permute.xlu0 %453 }
 0x18f   : > { %550 = vst [vmem:[#allocation2 + $0x20] sm:$0xf0] %v546_v10  ;;  %v456_v13 = vsel %vm455_vm3, %v452_v11, %v454_v12  ;;  %v457_v14 = vsel %vm455_vm3, %v454_v12, %v452_v11 }
 0x190   : > { %v458_v15 = vsel %vm441_vm13, %v457_v14, 0.0  ;;  %v463_v16 = vrot.slane %v456_v13, 4 }
 0x191   : > { %v462_v17 = vrot.slane %v458_v15, 4 }
 0x192   : > { %467 = vst [vmem:[#allocation2] sm:$0xf0] %v463_v16  ;;  %v435_v18 = vpop.permute.xlu1 %434  ;;  %v437_v20 = vpop.permute.xlu0 %436 }
 0x193   : > { %466 = vst [vmem:[#allocation2 + $0x30] sm:$0xf0] %v462_v17  ;;  %v439_v21 = vsel %vm438_vm2, %v435_v18, %v437_v20  ;;  %v440_v22 = vsel %vm438_vm2, %v437_v20, %v435_v18 }
 0x194   : > { %v447_v23 = vsel %vm445_vm1, %v440_v22, 0.0  ;;  %v448_v24 = vsel %vm1359_vm7, %v439_v21, 0.0  ;;  %v567_v28 = vld [vmem:[#allocation2 + $0x10] sm:$0xff] }
 0x195   : > { %449 = vst [vmem:[#allocation2 + $0x30] sm:$0xf] %v447_v23  ;;  %450 = vst [vmem:[#allocation2] sm:$0xf] %v448_v24  ;;  %v570_v26 = vld [vmem:[#allocation2 + $0x8] sm:$0xff]  ;;  %v566_v29 = vld [vmem:[#allocation2 + $0x18] sm:$0xff] }
 0x196   : > { %v571_v25 = vld [vmem:[#allocation2 + $0x20] sm:$0xff] }
 0x197   : > { %614 = vmatprep.subr.mxu1 %v571_v25 }
 0x198   : > { %615 = vmatpush1.msra.mxu1 %v570_v26 }
 0x199   : > { %616 = vmatprep.subr.mxu1 %v569_v27 }
 0x19a   : > { %617 = vmatpush1.msra.mxu1 %v568_v19 }
 0x19b   : > { %618 = vmatprep.subr.mxu1 %v567_v28 }
 0x19c   : > { %619 = vmatpush1.msra.mxu1 %v566_v29  ;;  %v565_v30 = vld [vmem:[#allocation2] sm:$0xff]  ;;  %v564_v31 = vld [vmem:[#allocation2 + $0x30] sm:$0xff] }
 0x19d   : > { %620 = vmatprep.subr.mxu1 %v565_v30 }
 0x19e   : > { %621 = vmatpush1.msra.mxu1 %v564_v31 }
 0x19f   : > { %929 = vmatmul.mubr.msk.f32.vlgmr.msra.gmra.mxu1 %vm579_vm4, %v337_v32  ;;  %v577_v33 = vpop.permute.xlu1 %576 }
 0x25f   : > { %v656_v34 = vpop.f32.mrf.mxu1 }
 0x260   : > { %v657_v35 = vadd.f32 %v656_v34, %v577_v33 }
 0x261   : > { %v658_v36 = vpop.f32.mrf.mxu1 }
 0x262   : > { %v659_v37 = vadd.f32 %v658_v36, %v577_v33  ;;  %v661_v38 = vmax.f32 %v657_v35, 0.0 }
 0x264   : > { %v662_v39 = vmax.f32 %v659_v37, 0.0 }
 0x266   : > { %v665_v41 = vcombine.low %v661_v38, %v662_v39  ;;  %930 = vmatprep.subr.msk.mxu0 %vm583_vm11, %v662_v39 }
 0x267   : > { %931 = vmatpush1.msk.msra.mxu0 %vm583_vm11, %v661_v38 }
 0x268   : > { %932 = vmatmul.mubr.msk.f32.vlgmr.msra.gmra.mxu0 %vm678_vm5, %v339_v40  ;;  %667 = vst [vmem:[%s334_s16] sm:$0xff] %v665_v41 }
 0x269   : > { %759 = vmatprep.mubr.f32.mxu0 %v1138_v0 }
 0x26c   : > { %933 = vmatmul.mubr.msk.f32.gmra.mxu0 %vm678_vm5, %v340_v42 }
 0x26d   : > { %1052 = shalt.err (!%p1049_p10)
}
 0x26e   : > { %s1053_s24 = scalar_lea.hbm %s812_s25, 128  ;;  %s1057_s10 = scalar_lea.hbm %s1504_s8, 256 }
 0x26f   : > { %p1054_p0 = scmp.ne.s32.totalorder %s812_s25, %s1053_s24  ;;  %p1058_p1 = scmp.lt.s32.totalorder %s812_s25, %s1504_s8 }
 0x270   : > { %p1059_p3 = scmp.lt.s32.totalorder %s1057_s10, %s1053_s24 }
 0x271   : > { %p1055_p2 = pnand %p1054_p0, %p1524_p12 }
 0x272   : > { %p1060_p6 = por %p1059_p3, %p1058_p1 }
 0x273   : > { %p1056_p9 = pneg %p1055_p2 }
 0x275   : > { %p1061_p11 = pnand %p1060_p6, %p1056_p9 }
 0x277   : > { %1064 = shalt.err (!%p1061_p11)
}
 0x278   : > { %948 = dma.vmem_to_hbm [thread:$0]  (%p1524_p12), %s815_s20, 128, %s812_s25, %s784_s22   ;;  %v671_v0 = vpop.permute.xlu0 %670  ;;  %v676_v48 = vpop.permute.xlu1 %675 }
 0x279   : > { %s1525_s21 = sshll.u32 %s1293_s14, 5  ;;  %s943_s20 = sshll.u32 %s1217_s9, 9 }
 0x27a   : > { %s327_s15 = scalar_lea.vmem [#allocation6], %s1525_s21  ;;  %s1452_s13 = scalar_lea.hbm %s1503_s7, %s943_s20 }
 0x27b   : > { %s797_s25 = sshll.u32 %s327_s15, 4  ;;  %s779_s24 = scalar_lea.sflag [#allocation5], %s1293_s14  ;;  %s1447_s25 = int_to_ptr.vmem [resolvable:$true] %s797_s25 }
 0x27c   : > { %s1065_s16 = scalar_lea.vmem %s1447_s25, 512  ;;  %s1149_s9 = smov [#allocation6]  }
 0x27d   : > { %p1066_p13 = scmp.ne.s32.totalorder %s1447_s25, %s1065_s16  ;;  %s1069_s26 = sshll.u32 %s1149_s9, 4  ;;  %s1070_s26 = int_to_ptr.vmem [resolvable:$false] %s1069_s26 }
 0x27e   : > { %s1071_s10 = scalar_lea.vmem %s1070_s26, 1024  ;;  %p1072_p7 = scmp.lt.s32.totalorder %s1447_s25, %s1070_s26 }
 0x27f   : > { %p1067_p4 = pnand %p1066_p13, %p1524_p12  ;;  %p1073_p8 = scmp.lt.s32.totalorder %s1071_s10, %s1065_s16 }
 0x281   : > { %p1068_p5 = pneg %p1067_p4  ;;  %p1074_p10 = por %p1073_p8, %p1072_p7 }
 0x283   : > { %p1075_p0 = pnand %p1074_p10, %p1068_p5 }
 0x328   : > { %v755_v43 = vpop.f32.mrf.mxu0 }
 0x329   : > { %v756_v44 = vadd.f32 %v755_v43, %v671_v0 }
 0x32a   : > { %v757_v45 = vpop.f32.mrf.mxu0 }
 0x32b   : > { %v766_v46 = vadd.f32 %v756_v44, %v1312_v5  ;;  %v758_v47 = vadd.f32 %v757_v45, %v671_v0 }
 0x32c   : > { %v761_v49 = vpop.f32.mrf.mxu0 }
 0x32d   : > { %v770_v50 = vmax.f32 %v766_v46, 0.0  ;;  %v767_v51 = vadd.f32 %v758_v47, %v1309_v4  ;;  %v762_v52 = vadd.f32 %v761_v49, %v676_v48 }
 0x32e   : > { %v763_v53 = vpop.f32.mrf.mxu0 }
 0x32f   : > { %774 = vst [vmem:[%s327_s15] sm:$0xff] %v770_v50  ;;  %v771_v54 = vmax.f32 %v767_v51, 0.0  ;;  %v768_v55 = vadd.f32 %v762_v52, %v1307_v3  ;;  %v764_v56 = vadd.f32 %v763_v53, %v676_v48 }
 0x331   : > { %775 = vst [vmem:[%s327_s15 + $0x8] sm:$0xff] %v771_v54  ;;  %v772_v5 = vmax.f32 %v768_v55, 0.0  ;;  %v769_v57 = vadd.f32 %v764_v56, %v1305_v2 }
 0x333   : > { %776 = vst [vmem:[%s327_s15 + $0x10] sm:$0xff] %v772_v5  ;;  %v773_v4 = vmax.f32 %v769_v57, 0.0 }
 0x335   : > { %777 = vst [vmem:[%s327_s15 + $0x18] sm:$0xff] %v773_v4 }
 0x336   : > { %1078 = shalt.err (!%p1075_p0)
}
 0x337   : > { %s1079_s12 = scalar_lea.hbm %s1452_s13, 512  ;;  %s1083_s15 = scalar_lea.hbm %s1503_s7, 1024 }
 0x338   : > { %p1080_p2 = scmp.ne.s32.totalorder %s1452_s13, %s1079_s12  ;;  %p1084_p3 = scmp.lt.s32.totalorder %s1452_s13, %s1503_s7 }
 0x339   : > { %p1085_p6 = scmp.lt.s32.totalorder %s1083_s15, %s1079_s12 }
 0x33a   : > { %p1081_p9 = pnand %p1080_p2, %p1524_p12 }
 0x33b   : > { %p1086_p11 = por %p1085_p6, %p1084_p3 }
 0x33c   : > { %p1082_p1 = pneg %p1081_p9 }
 0x33e   : > { %p1087_p13 = pnand %p1086_p11, %p1082_p1 }
 0x340   : > { %1090 = shalt.err (!%p1087_p13)
}
 0x341   : > { %s1150_s23 = smov 256   ;;  %s1526_s16 = smov 16  }
 0x342   : > { %947 = dma.vmem_to_hbm [thread:$0]  (%p1524_p12), %s1447_s25, 512, %s1452_s13, %s779_s24, %s1150_s23, %s1150_s23, %s1526_s16  }
 0x343 PF: > { %s826_s9 = sand.u32 1, %s1121_s27   ;;  %p1527_p4 = scmp.ne.s32.totalorder %s1513_s18, 0 }
 0x344   : > { %p1528_p5 = scmp.ge.s32.totalorder %s1133_s30, 2  ;;  %s827_s26 = scalar_lea.sflag [#allocation5], %s826_s9 }
 0x346   : > { %p956_p7 = pnand %p1528_p5, %p1527_p4 }
 0x348   : > { %p957_p8 = pneg %p956_p7 }
 0x34a   : > { %1112 = dma.done.wait (%p957_p8), %s827_s26, 512  }
 0x34b   : > { %1114 = vsyncadd (%p957_p8), %s827_s26, 4294966784  ;;  %s836_s10 = scalar_lea.sflag [#allocation8], %s826_s9 }
 0x34c   : > { %1116 = dma.done.wait (%p957_p8), %s836_s10, 128  }
 0x34d   : > { %1118 = vsyncadd (%p957_p8), %s836_s10, 4294967168  ;;  %s1529_s17 = sld [smem:[#allocation12_spill]]  ;;  %p25_p12 = scmp.ge.s32.totalorder %s1221_s11, 4  }
 0x34e   : > { %s1530_s27 = smov %s1125_s28  ;;  %s1531_s28 = smov %s1129_s29 }
 0x34f   : > { %s1533_s30 = smov %s1221_s11  ;;  %27 = sbr.rel (!%p25_p12) target bundleno = 7 (0x7), region = 110 }
 0x353   : > { %s1532_s29 = smov %s1529_s17 }
 0x354   :  { %841 = vsyncpa [#allocation4], 1 }
 0x355   :  { %843 = vsyncpa [#allocation4 + $0x1], 1 }
 0x356   :  { %844 = vsyncpa [#allocation5], 1 }
 0x357   :  { %846 = vsyncpa [#allocation5 + $0x1], 1 }
 0x358   :  { %847 = vsyncpa [#allocation8], 1 }
 0x359   :  { %849 = vsyncpa [#allocation8 + $0x1], 1 }

</bundles_post_ra>
